<compile_context>
chip_gen: v6e
topology: v6e:2x2x1
jax: 0.10.0
libtpu: 0.0.40
codegen_flags: <defaults>
</compile_context>

<pallas_src>
import jax
import jax.numpy as jnp
from jax.experimental import pallas as pl
from jax.experimental.pallas import tpu as pltpu

LANE = 128
SUBLANE = 8
TARGET_BLOCK_BYTES = 2 * 1024 * 1024      # per-block; 4 resident buffers = 8 MiB
MAX_WIDE_BLOCK_BYTES = 4 * 1024 * 1024    # cap when keeping the full trailing dim


def _binarize01_kernel(x_ref, o_ref):
    # (x >= 0) -> {0, 1} in the output dtype (NaN compares False -> 0,
    # matching PyTorch).
    o_ref[...] = (x_ref[...] >= 0).astype(o_ref.dtype)


def _packed_sublanes(itemsize):
    # f32 -> 8, bf16/f16 -> 16, int8/uint8/fp8 -> 32
    return SUBLANE * max(1, 4 // int(itemsize))


def binarize01_act(x, grad_scale=None, *, donate_input=False):
    """Forward of Binarize01Act. `grad_scale` is a registered buffer that only
    affects the backward pass in PyTorch; it is accepted for fidelity but
    unused in the forward computation.

    `donate_input=True` aliases the input buffer to the output (use only when
    the caller does not reuse x), halving the HBM footprint of this op.
    """
    del grad_scale  # forward does not use it

    orig_shape = x.shape
    dtype = x.dtype
    total = int(x.size)
    if total == 0:
        return x

    itemsize = int(jnp.dtype(dtype).itemsize)
    packing = _packed_sublanes(itemsize)

    # ---- choose a no-copy 2-D view -------------------------------------
    # Fast path: a lane-dense width (multiple of 128) dividing the total, so
    # the contiguous reshape is free and stores are unmasked vst.
    # NOTE: the "free reshape" assumption holds for contiguous default-layout
    # inputs; a transposed upstream tensor would incur one extra copy here.
    cols = None
    for c in (1024, 512, 256, 128):
        if total % c == 0:
            cols = c
            break

    padded_total = total
    if cols is not None:
        x2 = x.reshape(total // cols, cols)
    else:
        # No-copy fallback: collapse leading dims, keep the true trailing dim
        # as a full-extent lane block (allowed even when not 128-divisible);
        # Pallas masks the ragged lane stores. No pad/slice HBM passes.
        if x.ndim == 0:
            x = x.reshape(1, 1)
        last = int(x.shape[-1])
        lead = total // last
        if last * itemsize * packing <= MAX_WIDE_BLOCK_BYTES:
            cols = last
            x2 = x.reshape(lead, last)
        else:
            # TODO(synk): pathological case (huge non-128-multiple trailing
            # dim) — keep a padded path rather than blow the VMEM budget.
            cols = LANE
            chunk = packing * LANE
            padded_total = pl.cdiv(total, chunk) * chunk
            x2 = jnp.pad(x.reshape(-1), (0, padded_total - total)).reshape(
                padded_total // cols, cols
            )

    rows = x2.shape[0]

    # ---- row tile --------------------------------------------------------
    tm = TARGET_BLOCK_BYTES // (cols * itemsize)
    tm = max(packing, (tm // packing) * packing)
    if rows < packing:
        tm = rows  # block equals full sublane extent (allowed by layout rules)
    elif rows >= 2 * packing:
        # v7x has 2 TensorCores: keep at least 2 grid blocks so the
        # "parallel" grid axis actually shards streaming across both cores.
        half = max(packing, (rows // 2) // packing * packing)
        tm = min(tm, half)
    else:
        tm = packing
    grid = (pl.cdiv(rows, tm),)

    out2 = pl.pallas_call(
        _binarize01_kernel,
        out_shape=jax.ShapeDtypeStruct((rows, cols), dtype),
        grid_spec=pl.GridSpec(
            grid=grid,
            in_specs=[pl.BlockSpec((tm, cols), lambda i: (i, 0))],
            out_specs=pl.BlockSpec((tm, cols), lambda i: (i, 0)),
        ),
        compiler_params=pltpu.CompilerParams(
            dimension_semantics=("parallel",),
        ),
        cost_estimate=pl.CostEstimate(
            flops=total,
            transcendentals=0,
            bytes_accessed=2 * total * itemsize,
        ),
        input_output_aliases=({0: 0} if donate_input else {}),
    )(x2)

    if padded_total != total:
        return out2.reshape(-1)[:total].reshape(orig_shape)
    return out2.reshape(orig_shape)


class Binarize01Act:
    """Minimal JAX-side mirror of the PyTorch module (forward only)."""

    def __init__(self, grad_scale=1):
        # deterministic "buffer" init, matching register_buffer('grad_scale', ...)
        self.grad_scale = jnp.float32(float(grad_scale))

    def __call__(self, x):
        # TODO(synk): AbstractTensor / MultiSampleTensor wrapper paths (interval
        # propagation + rsloss auxiliary loss) and the soft-tanh STE backward
        # are training-time bookkeeping around the same elementwise op; only
        # the plain-tensor forward is kernelized here.
        return binarize01_act(x, self.grad_scale)


if __name__ == "__main__":
    key = jax.random.PRNGKey(0)
    act = Binarize01Act(grad_scale=1)

    # Main check: NCHW conv-style activation (free-reshape fast path).
    x = jax.random.normal(key, (2, 4, 16, 16), dtype=jnp.float32)
    y = jax.block_until_ready(act(x))
    y_ref = (x >= 0).astype(x.dtype)
    assert y.shape == x.shape and y.dtype == x.dtype
    assert bool(jnp.all(y == y_ref))

    # Awkward shape (total not a multiple of 128): no-copy masked-store path,
    # also exercises the >= 2-block grid split.
    k2 = jax.random.PRNGKey(1)
    x_odd = jax.random.normal(k2, (3, 5, 7, 11), dtype=jnp.float32)
    y_odd = jax.block_until_ready(binarize01_act(x_odd))
    assert y_odd.shape == x_odd.shape and y_odd.dtype == x_odd.dtype
    assert bool(jnp.all(y_odd == (x_odd >= 0).astype(x_odd.dtype)))

    # bf16 path (packed sublane alignment).
    x_bf = jax.random.normal(k2, (2, 4, 16, 16), dtype=jnp.bfloat16)
    y_bf = jax.block_until_ready(binarize01_act(x_bf))
    assert y_bf.dtype == jnp.bfloat16
    assert bool(jnp.all(y_bf == (x_bf >= 0).astype(jnp.bfloat16)))

    # Larger fast-path shape: many row blocks, both TCs busy on v7x.
    x_big = jax.random.normal(key, (8, 32, 32, 32), dtype=jnp.float32)
    y_big = jax.block_until_ready(binarize01_act(x_big))
    assert bool(jnp.all(y_big == (x_big >= 0).astype(x_big.dtype)))

    print("KERNEL_OK")
</pallas_src>

<mosaic_0001>
module attributes {stable_mosaic.version = 11 : i64} {
  func.func @_binarize01_kernel(%arg0: i32, %arg1: memref<2x1024xf32, #tpu.memory_space<vmem>>, %arg2: memref<2x1024xf32, #tpu.memory_space<vmem>>) attributes {dimension_semantics = [#tpu.dimension_semantics<parallel>], iteration_bounds = array<i64: 1>, scalar_prefetch = 0 : i64, scratch_operands = 0 : i64, tpu.core_type = #tpu.core_type<tc>, window_params = [{transform_indices = @transform_0, window_bounds = array<i64: 2, 1024>}, {transform_indices = @transform_1, window_bounds = array<i64: 2, 1024>}]} {
    %c0 = arith.constant 0 : index
    %c0_0 = arith.constant 0 : index
    %0 = vector.load %arg1[%c0, %c0_0] : memref<2x1024xf32, #tpu.memory_space<vmem>>, vector<2x1024xf32>
    %cst = arith.constant 0.000000e+00 : f32
    %1 = vector.broadcast %cst : f32 to vector<2x1024xf32>
    %2 = arith.cmpf oge, %0, %1 : vector<2x1024xf32>
    %3 = arith.extui %2 : vector<2x1024xi1> to vector<2x1024xi32>
    %4 = arith.sitofp %3 : vector<2x1024xi32> to vector<2x1024xf32>
    %c0_1 = arith.constant 0 : index
    %c0_2 = arith.constant 0 : index
    %5 = vector.load %arg2[%c0_1, %c0_2] : memref<2x1024xf32, #tpu.memory_space<vmem>>, vector<2x1024xf32>
    tpu.vector_store %arg2[%c0_1, %c0_2], %4 {strides = array<i32>} : memref<2x1024xf32, #tpu.memory_space<vmem>>, vector<2x1024xf32>,
    return
  }
  func.func @transform_0(%arg0: i32) -> (i32, i32) {
    %c0_i32 = arith.constant 0 : i32
    %c0_i32_0 = arith.constant 0 : i32
    return %arg0, %c0_i32 : i32, i32
  }
  func.func @transform_1(%arg0: i32) -> (i32, i32) {
    %c0_i32 = arith.constant 0 : i32
    %c0_i32_0 = arith.constant 0 : i32
    return %arg0, %c0_i32 : i32, i32
  }
}

</mosaic_0001>

<bundles_post_ra>
// kernel: tpu_custom_call.1
= control target key start
LH: loop header
LB: loop body
LE: loop exit
PB: predicated region body
PF: predicated region fallthrough
CT: control target
= control target key end

     0   :  { %6 = vsyncpa [#allocation3], 0  ;;  %s114_s0 = inlined_call_operand.hbm [shape: f32[2,1024], index: 0, kind: input, shape index: {}]   ;;  %s115_s1 = inlined_call_operand.hbm [shape: f32[2,1024], index: 1, kind: output, shape index: {}]  }
   0x1   :  { %7 = vsyncpa [#allocation4], 0  ;;  %s95_s6 = smov [#allocation2]  }
   0x2   :  { %s14_s7 = sshll.u32 %s95_s6, 4  ;;  %s15_s7 = int_to_ptr.vmem [resolvable:$true] %s14_s7 }
   0x3   :  { %s59_s8 = scalar_lea.vmem %s15_s7, 256  ;;  %p64_p1 = scmp.lt.s32.totalorder %s15_s7, %s15_s7 }
   0x4   :  { %p60_p0 = scmp.ne.s32.totalorder %s15_s7, %s59_s8  ;;  %p65_p2 = scmp.lt.s32.totalorder %s59_s8, %s59_s8 }
   0x6   :  { %p66_p3 = por %p65_p2, %p64_p1 }
   0x8   :  { %p67_p4 = pnand %p66_p3, %p60_p0 }
   0xa   :  { %70 = shalt.err (!%p67_p4)
}
   0xb   :  { %17 = dma.hbm_to_vmem [thread:$0]  %s114_s0, 256, %s15_s7, [#allocation3]  }
   0xc   :  { %91 = dma.done.wait [#allocation3], 256  }
   0xd   :  { %92 = vsyncadd [#allocation3], 4294967040  ;;  %s96_s11 = smov [#allocation5]   ;;  %v21_v0 = vld [vmem:[#allocation2] sm:$0xff]  ;;  %v22_v1 = vld [vmem:[#allocation2 + $0x8] sm:$0xff]  ;;  %v97_v2 = vmov 0.0  }
   0xe   :  { %s37_s12 = sshll.u32 %s96_s11, 4  ;;  %vm23_vm0 = vcmp.ge.f32.partialorder %v21_v0, 0.0  ;;  %vm24_vm1 = vcmp.ge.f32.partialorder %v22_v1, 0.0  ;;  %s38_s12 = int_to_ptr.vmem [resolvable:$true] %s37_s12 }
   0xf   :  { %v46_v3 = vsel %vm23_vm0, 1.0, %v97_v2  ;;  %v47_v4 = vsel %vm24_vm1, 1.0, %v97_v2  ;;  %s71_s13 = scalar_lea.vmem %s38_s12, 256  ;;  %p76_p6 = scmp.lt.s32.totalorder %s38_s12, %s38_s12 }
  0x10   :  { %29 = vst [vmem:[#allocation5] sm:$0xff] %v46_v3  ;;  %30 = vst [vmem:[#allocation5 + $0x8] sm:$0xff] %v47_v4  ;;  %p72_p5 = scmp.ne.s32.totalorder %s38_s12, %s71_s13  ;;  %p77_p7 = scmp.lt.s32.totalorder %s71_s13, %s71_s13 }
  0x12   :  { %p78_p8 = por %p77_p7, %p76_p6 }
  0x14   :  { %p79_p9 = pnand %p78_p8, %p72_p5 }
  0x16   :  { %82 = shalt.err (!%p79_p9)
}
  0x17   :  { %40 = dma.vmem_to_hbm [thread:$0]  %s38_s12, 256, %s115_s1, [#allocation4]  }
  0x18   :  { %93 = dma.done.wait [#allocation4], 256  }
  0x19   :  { %94 = vsyncadd [#allocation4], 4294967040 }
  0x1a   :  { %44 = vsyncpa [#allocation3], 1 }
  0x1b   :  { %45 = vsyncpa [#allocation4], 1 }

</bundles_post_ra>
